<compile_context>
chip_gen: v7x
topology: tpu7x:2x2x1
jax: 0.10.0
libtpu: 0.0.40
codegen_flags: <defaults>
</compile_context>

<pallas_src>
import functools
import math

import jax
import jax.numpy as jnp
from jax.experimental import pallas as pl
from jax.experimental.pallas import tpu as pltpu


# ----------------------------- tiling / vmem helpers -----------------------------

def _round_up(x, m):
    return ((x + m - 1) // m) * m


def _pick_tile(dim, cap):
    """Return (tile, padded_dim).  `cap` must already be a multiple of the required
    (8 / 128) alignment.  Small dims use a full-extent block (exempt from the (8,128) rule);
    large dims are padded to a multiple of `cap` (no divisor search, no tiny tiles)."""
    if dim <= cap:
        return dim, dim
    return cap, _round_up(dim, cap)


def _pad_to(x, shape, value=0):
    pads = [(0, t - s) for s, t in zip(x.shape, shape)]
    if all(p == (0, 0) for p in pads):
        return x
    return jnp.pad(x, pads, constant_values=value)


@functools.lru_cache(maxsize=1)
def _vmem_limit():
    """Generation-aware scoped-VMEM limit (v5e/v6e: 128 MiB physical, v7x: 64 MiB)."""
    try:
        cap = int(getattr(pltpu.get_tpu_info(), "vmem_capacity_bytes", 64 * 1024 * 1024))
    except Exception:
        cap = 64 * 1024 * 1024
    return max(32 * 1024 * 1024, int(cap * 0.75))


# ----------------------------- LayerNorm (row-tiled) -----------------------------

def _layernorm_kernel(x_ref, g_ref, b_ref, o_ref, *, eps):
    x = x_ref[...].astype(jnp.float32)
    mu = jnp.mean(x, axis=-1, keepdims=True)
    var = jnp.mean(jnp.square(x - mu), axis=-1, keepdims=True)
    y = (x - mu) * jax.lax.rsqrt(var + eps)
    o_ref[...] = (y * g_ref[...] + b_ref[...]).astype(o_ref.dtype)


def layernorm(x, gamma, beta, eps=1e-5):
    """x: (..., F). Computes in float32 and casts back (LayerNorm wrapper semantics).
    gamma/beta are expected pre-cast to f32 (prepare_params)."""
    orig_shape = x.shape
    F = orig_shape[-1]
    x2 = x.reshape(-1, F)
    R = x2.shape[0]
    tm, Rp = _pick_tile(R, 256)
    x2 = _pad_to(x2, (Rp, F))
    out = pl.pallas_call(
        functools.partial(_layernorm_kernel, eps=eps),
        out_shape=jax.ShapeDtypeStruct((Rp, F), x.dtype),
        grid=(Rp // tm,),
        in_specs=[
            pl.BlockSpec((tm, F), lambda i: (i, 0)),
            pl.BlockSpec((1, F), lambda i: (0, 0)),
            pl.BlockSpec((1, F), lambda i: (0, 0)),
        ],
        out_specs=pl.BlockSpec((tm, F), lambda i: (i, 0)),
        compiler_params=pltpu.CompilerParams(
            dimension_semantics=("parallel",), vmem_limit_bytes=_vmem_limit()),
    )(x2, gamma.reshape(1, F), beta.reshape(1, F))
    return out[:R].reshape(orig_shape)


# ----------------------------- Linear (tiled matmul + fused epilogue) -----------------------------

def _linear_kernel(*refs, activation, has_residual):
    if has_residual:
        x_ref, w_ref, b_ref, r_ref, o_ref, acc_ref = refs
    else:
        x_ref, w_ref, b_ref, o_ref, acc_ref = refs
        r_ref = None
    k = pl.program_id(2)

    @pl.when(k == 0)
    def _():
        acc_ref[...] = jnp.zeros_like(acc_ref)

    acc_ref[...] += jnp.dot(x_ref[...].astype(jnp.bfloat16),
                            w_ref[...].astype(jnp.bfloat16),
                            preferred_element_type=jnp.float32)

    @pl.when(k == pl.num_programs(2) - 1)
    def _():
        out = acc_ref[...] + b_ref[...].astype(jnp.float32)
        if activation == "relu":
            out = jnp.maximum(out, 0.0)
        if has_residual:
            out = out + r_ref[...].astype(jnp.float32)
        o_ref[...] = out.astype(o_ref.dtype)


def linear(x, w, b=None, residual=None, activation=None):
    """x: (..., K), w: (K, N) (bf16 weights), b: (N,) or None.
    bf16 MXU feeds with an f32 accumulator; bias / ReLU / residual fused into the writeback."""
    K, N = w.shape
    orig_shape = x.shape
    x2 = x.reshape(-1, K)
    M = x2.shape[0]
    if b is None:
        b = jnp.zeros((N,), jnp.float32)
    tm, Mp = _pick_tile(M, 256)
    tn, Np = _pick_tile(N, 256)
    tk, Kp = _pick_tile(K, 512)
    x2p = _pad_to(x2, (Mp, Kp))
    wp = _pad_to(w, (Kp, Np))
    bp = _pad_to(b.reshape(1, N).astype(jnp.float32), (1, Np))

    operands = [x2p, wp, bp]
    in_specs = [
        pl.BlockSpec((tm, tk), lambda i, j, k: (i, k)),
        pl.BlockSpec((tk, tn), lambda i, j, k: (k, j)),
        pl.BlockSpec((1, tn), lambda i, j, k: (0, j)),
    ]
    has_res = residual is not None
    if has_res:
        r2p = _pad_to(residual.reshape(-1, N), (Mp, Np))
        operands.append(r2p)
        in_specs.append(pl.BlockSpec((tm, tn), lambda i, j, k: (i, j)))

    out = pl.pallas_call(
        functools.partial(_linear_kernel, activation=activation, has_residual=has_res),
        out_shape=jax.ShapeDtypeStruct((Mp, Np), x.dtype),
        grid=(Mp // tm, Np // tn, Kp // tk),
        in_specs=in_specs,
        out_specs=pl.BlockSpec((tm, tn), lambda i, j, k: (i, j)),
        scratch_shapes=[pltpu.VMEM((tm, tn), jnp.float32)],
        compiler_params=pltpu.CompilerParams(
            dimension_semantics=("parallel", "parallel", "arbitrary"),
            vmem_limit_bytes=_vmem_limit()),
    )(*operands)
    return out[:M, :N].reshape(orig_shape[:-1] + (N,))


# ----------------------------- Flash-style attention -----------------------------

def _flash_attn_kernel(q_ref, k_ref, v_ref, msk_ref, o_ref, m_ref, l_ref, acc_ref,
                       *, scale, causal, tq, tk):
    ki = pl.program_id(2)

    @pl.when(ki == 0)
    def _():
        m_ref[...] = jnp.full_like(m_ref, -1e30)
        l_ref[...] = jnp.zeros_like(l_ref)
        acc_ref[...] = jnp.zeros_like(acc_ref)

    q = q_ref[0].astype(jnp.bfloat16)                     # (tq, dh)
    k = k_ref[0].astype(jnp.bfloat16)                     # (tk, dh)
    s = jax.lax.dot_general(q, k, (((1,), (1,)), ((), ())),
                            preferred_element_type=jnp.float32) * scale  # (tq, tk) f32

    key_ok = msk_ref[0] > 0                               # (1, tk)
    if causal:
        qi = pl.program_id(1)
        row = jax.lax.broadcasted_iota(jnp.int32, (tq, tk), 0) + qi * tq
        col = jax.lax.broadcasted_iota(jnp.int32, (tq, tk), 1) + ki * tk
        allowed = jnp.logical_and(col <= row, key_ok)
    else:
        allowed = jnp.broadcast_to(key_ok, (tq, tk))
    s = jnp.where(allowed, s, -1e30)

    m_old = m_ref[...]
    m_new = jnp.maximum(m_old, jnp.max(s, axis=-1, keepdims=True))
    alpha = jnp.exp(m_old - m_new)
    p = jnp.exp(s - m_new)
    l_ref[...] = l_ref[...] * alpha + jnp.sum(p, axis=-1, keepdims=True)
    acc_ref[...] = acc_ref[...] * alpha + jnp.dot(
        p.astype(jnp.bfloat16), v_ref[0].astype(jnp.bfloat16),
        preferred_element_type=jnp.float32)
    m_ref[...] = m_new

    @pl.when(ki == pl.num_programs(2) - 1)
    def _():
        inv = pl.reciprocal(l_ref[...], approx=True)
        o_ref[0] = (acc_ref[...] * inv).astype(o_ref.dtype)


def mha_attention(q, k, v, key_mask, num_heads, causal=False):
    """q: (B, Tq, D), k/v: (B, Tk, D), key_mask: (B, Tk) int (1 = attend).
    Flash-style: grid over (batch*head, q-tile, k-tile) with online softmax in VMEM scratch.
    Returns (B, Tq, D) in q.dtype."""
    B, Tq, D = q.shape
    Tk = k.shape[1]
    H = num_heads
    dh = D // H
    scale = 1.0 / math.sqrt(dh)

    def to_heads(x, T):
        return x.reshape(B, T, H, dh).transpose(0, 2, 1, 3).reshape(B * H, T, dh)

    tq, Tq_p = _pick_tile(Tq, 128)
    tk, Tk_p = _pick_tile(Tk, 256)

    qh = _pad_to(to_heads(q, Tq), (B * H, Tq_p, dh))
    kh = _pad_to(to_heads(k, Tk), (B * H, Tk_p, dh))
    vh = _pad_to(to_heads(v, Tk), (B * H, Tk_p, dh))
    mask3 = _pad_to(key_mask.reshape(B, 1, Tk).astype(jnp.int32), (B, 1, Tk_p))

    # TODO(synk): for production dh (64/80) pair heads per grid step so stores span >=128 lanes.
    out = pl.pallas_call(
        functools.partial(_flash_attn_kernel, scale=scale, causal=causal, tq=tq, tk=tk),
        out_shape=jax.ShapeDtypeStruct((B * H, Tq_p, dh), q.dtype),
        grid=(B * H, Tq_p // tq, Tk_p // tk),
        in_specs=[
            pl.BlockSpec((1, tq, dh), lambda bh, qi, ki: (bh, qi, 0)),
            pl.BlockSpec((1, tk, dh), lambda bh, qi, ki: (bh, ki, 0)),
            pl.BlockSpec((1, tk, dh), lambda bh, qi, ki: (bh, ki, 0)),
            pl.BlockSpec((1, 1, tk), lambda bh, qi, ki: (bh // H, 0, ki)),
        ],
        out_specs=pl.BlockSpec((1, tq, dh), lambda bh, qi, ki: (bh, qi, 0)),
        scratch_shapes=[pltpu.VMEM((tq, 1), jnp.float32),
                        pltpu.VMEM((tq, 1), jnp.float32),
                        pltpu.VMEM((tq, dh), jnp.float32)],
        compiler_params=pltpu.CompilerParams(
            dimension_semantics=("parallel", "parallel", "arbitrary"),
            vmem_limit_bytes=_vmem_limit()),
    )(qh, kh, vh, mask3)

    out = out[:, :Tq, :].reshape(B, H, Tq, dh).transpose(0, 2, 1, 3).reshape(B, Tq, D)
    return out


# ----------------------------- Fused LM head + cross-entropy -----------------------------

def _lmhead_ce_kernel(x_ref, e_ref, lab_ref, loss_ref, valid_ref,
                      m_ref, l_ref, p_ref, *, tv, vocab):
    vi = pl.program_id(1)

    @pl.when(vi == 0)
    def _():
        m_ref[...] = jnp.full_like(m_ref, -1e30)
        l_ref[...] = jnp.zeros_like(l_ref)
        p_ref[...] = jnp.zeros_like(p_ref)

    x = x_ref[...].astype(jnp.bfloat16)                   # (tm, D)
    e = e_ref[...].astype(jnp.bfloat16)                   # (tv, D) -- (V, D) table, contract on D
    s = jax.lax.dot_general(x, e, (((1,), (1,)), ((), ())),
                            preferred_element_type=jnp.float32)       # (tm, tv) f32

    col = jax.lax.broadcasted_iota(jnp.int32, s.shape, 1) + vi * tv
    s = jnp.where(col < vocab, s, -1e30)                  # mask padded vocab columns (f32)

    labels = lab_ref[...]                                 # (tm, 1) int32 (-100 = ignore)
    p_ref[...] += jnp.sum(jnp.where(col == labels, s, 0.0), axis=-1, keepdims=True)

    m_old = m_ref[...]
    m_new = jnp.maximum(m_old, jnp.max(s, axis=-1, keepdims=True))
    l_ref[...] = l_ref[...] * jnp.exp(m_old - m_new) + \
        jnp.sum(jnp.exp(s - m_new), axis=-1, keepdims=True)
    m_ref[...] = m_new

    @pl.when(vi == pl.num_programs(1) - 1)
    def _():
        valid = (labels != -100).astype(jnp.float32)
        loss_ref[...] = (m_ref[...] + jnp.log(l_ref[...]) - p_ref[...]) * valid
        valid_ref[...] = valid


def lm_head_ce_loss(x, embed_table_bf16, labels):
    """x: (R, D) hidden states, embed_table_bf16: (V, D) tied LM head, labels: (R,) int, -100 ignore.
    Logits never materialized: vocab axis is a tiled reduction with online logsumexp."""
    R, D = x.shape
    V = embed_table_bf16.shape[0]
    tm, Rp = _pick_tile(R, 256)
    tv, Vp = _pick_tile(V, 1024)
    xp = _pad_to(x, (Rp, D))
    ep = _pad_to(embed_table_bf16, (Vp, D))
    lab = _pad_to(labels.reshape(R, 1).astype(jnp.int32), (Rp, 1), value=-100)

    nll, valid = pl.pallas_call(
        functools.partial(_lmhead_ce_kernel, tv=tv, vocab=V),
        out_shape=(jax.ShapeDtypeStruct((Rp, 1), jnp.float32),
                   jax.ShapeDtypeStruct((Rp, 1), jnp.float32)),
        grid=(Rp // tm, Vp // tv),
        in_specs=[
            pl.BlockSpec((tm, D), lambda r, v: (r, 0)),
            pl.BlockSpec((tv, D), lambda r, v: (v, 0)),
            pl.BlockSpec((tm, 1), lambda r, v: (r, 0)),
        ],
        out_specs=(pl.BlockSpec((tm, 1), lambda r, v: (r, 0)),
                   pl.BlockSpec((tm, 1), lambda r, v: (r, 0))),
        scratch_shapes=[pltpu.VMEM((tm, 1), jnp.float32),
                        pltpu.VMEM((tm, 1), jnp.float32),
                        pltpu.VMEM((tm, 1), jnp.float32)],
        compiler_params=pltpu.CompilerParams(
            dimension_semantics=("parallel", "arbitrary"),
            vmem_limit_bytes=_vmem_limit()),
    )(xp, ep, lab)
    return jnp.sum(nll) / jnp.sum(valid)


# ----------------------------- model composition -----------------------------

def qformer_layer(x, enc, lp, num_heads):
    """BLIP-2 style Q-Former layer on query tokens: self-attn + cross-attn (post-LN).
    FFN is skipped: reference code sets layer.intermediate = layer.output = None."""
    B, NQ, _ = x.shape
    Tk = enc.shape[1]
    ones_q = jnp.ones((B, NQ), jnp.int32)
    ones_k = jnp.ones((B, Tk), jnp.int32)      # frame_atts == all ones
    # self-attention over query tokens (fused QKV, no mask)
    qkv = linear(x, lp['self_wqkv'], lp['self_bqkv'])
    q, k, v = jnp.split(qkv, 3, axis=-1)
    a = mha_attention(q, k, v, ones_q, num_heads, causal=False)
    a = linear(a, lp['self_wo'], lp['self_bo'], residual=x)     # residual fused into epilogue
    x = layernorm(a, lp['self_ln_g'], lp['self_ln_b'], eps=1e-12)
    # cross-attention: queries attend to video frame hidden states (fused KV)
    q = linear(x, lp['cross_wq'], lp['cross_bq'])
    kv = linear(enc, lp['cross_wkv'], lp['cross_bkv'])
    k, v = jnp.split(kv, 2, axis=-1)
    a = mha_attention(q, k, v, ones_k, num_heads, causal=False)
    a = linear(a, lp['cross_wo'], lp['cross_bo'], residual=x)
    x = layernorm(a, lp['cross_ln_g'], lp['cross_ln_b'], eps=1e-12)
    # TODO(synk): Q-Former FFN intentionally absent (reference nulls intermediate/output modules).
    return x


def opt_decoder_layer(x, key_mask, lp, num_heads):
    """OPT decoder layer (do_layer_norm_before=True): pre-LN causal self-attn + pre-LN ReLU FFN."""
    h = layernorm(x, lp['ln1_g'], lp['ln1_b'])
    qkv = linear(h, lp['wqkv'], lp['bqkv'])
    q, k, v = jnp.split(qkv, 3, axis=-1)
    a = mha_attention(q, k, v, key_mask, num_heads, causal=True)
    x = linear(a, lp['wo'], lp['bo'], residual=x)                 # x + out_proj(attn)
    h = layernorm(x, lp['ln2_g'], lp['ln2_b'])
    h = linear(h, lp['fc1_w'], lp['fc1_b'], activation='relu')    # fused ReLU
    x = linear(h, lp['fc2_w'], lp['fc2_b'], residual=x)           # x + fc2(...)
    return x


def forward(params, vid_features, input_ids, attention_mask, labels, cfg):
    B, T, N, F = vid_features.shape
    NQ = cfg['NQ']

    # 1. ln_vision (float32 LayerNorm, cast back)
    vf = layernorm(vid_features, params['ln_vision_g'], params['ln_vision_b'])

    # 2. frame position embeddings: 'b t n f' + pos[t][None, :, None, :]
    frame_pos = jnp.take(params['frame_pos_emb'], jnp.arange(T), axis=0)   # (T, F)
    frame_hidden = (vf + frame_pos[None, :, None, :]).reshape(B, T * N, F)  # b (t n) f

    # 3. video Q-Former (query tokens only; cross-attend to frames)
    q = jnp.broadcast_to(params['query_tokens'], (B, NQ, cfg['HQ'])).astype(jnp.float32)
    q = layernorm(q, params['qf_emb_ln_g'], params['qf_emb_ln_b'], eps=1e-12)
    for lp in params['qformer_layers']:
        q = qformer_layer(q, frame_hidden, lp, cfg['QH'])
    video_hidden = q

    # 4. opt_proj: Q-Former hidden -> OPT embedding dim
    inputs_opt = linear(video_hidden, params['opt_proj_w'], params['opt_proj_b'])  # (B, NQ, D)

    # 5. OPT decoder with visual prefix (embeds concat, mask concat, causal LM loss)
    tok_emb = jnp.take(params['opt_embed_tokens'], input_ids, axis=0)      # (B, S, D)
    emb = jnp.concatenate([inputs_opt, tok_emb], axis=1)                   # (B, L, D)
    mask_prefix = jnp.ones((B, NQ), attention_mask.dtype)
    mask = jnp.concatenate([mask_prefix, attention_mask], axis=1).astype(jnp.int32)  # (B, L)

    # HF OPT learned positional embedding: (cumsum(mask) * mask - 1) + offset(2)
    positions = jnp.cumsum(mask, axis=1) * mask - 1 + 2                    # (B, L)
    emb = emb + jnp.take(params['opt_embed_pos'], positions, axis=0)

    x = emb
    for lp in params['opt_layers']:
        x = opt_decoder_layer(x, mask, lp, cfg['OH'])
    x = layernorm(x, params['opt_final_ln_g'], params['opt_final_ln_b'])

    # 6. labels: [-100 for visual query tokens] ++ targets; shifted causal-LM CE, ignore_index=-100.
    #    LM head (tied to embed_tokens) is fused with the CE so (B, L, V) logits never hit HBM.
    visual_label = jnp.full((B, NQ), -100, jnp.int32)
    concat_targets = jnp.concatenate([visual_label, labels.astype(jnp.int32)], axis=1)  # (B, L)
    shift_x = x[:, :-1, :].reshape(-1, cfg['D'])
    shift_labels = concat_targets[:, 1:].reshape(-1)
    return lm_head_ce_loss(shift_x, params['opt_lm_head_bf16'], shift_labels)


# ----------------------------- deterministic parameter init + prep -----------------------------

def init_params(key, cfg):
    std = 0.02
    counter = [0]

    def nk():
        counter[0] += 1
        return jax.random.fold_in(key, counter[0])

    def nrm(shape):
        return std * jax.random.normal(nk(), shape, jnp.float32)

    F, HQ, NQ = cfg['F'], cfg['HQ'], cfg['NQ']
    D, FF, V = cfg['D'], cfg['FF'], cfg['V']

    p = {
        'ln_vision_g': jnp.ones((F,), jnp.float32),
        'ln_vision_b': jnp.zeros((F,), jnp.float32),
        'frame_pos_emb': nrm((cfg['max_frame_pos'], F)),
        'query_tokens': nrm((1, NQ, HQ)),
        'qf_emb_ln_g': jnp.ones((HQ,), jnp.float32),
        'qf_emb_ln_b': jnp.zeros((HQ,), jnp.float32),
        'opt_proj_w': nrm((HQ, D)),
        'opt_proj_b': jnp.zeros((D,), jnp.float32),
        'opt_embed_tokens': nrm((V, D)),
        'opt_embed_pos': nrm((cfg['max_pos'], D)),
        'opt_final_ln_g': jnp.ones((D,), jnp.float32),
        'opt_final_ln_b': jnp.zeros((D,), jnp.float32),
    }

    qlayers = []
    for _ in range(cfg['n_q_layers']):
        qlayers.append({
            'self_wq': nrm((HQ, HQ)), 'self_bq': jnp.zeros((HQ,), jnp.float32),
            'self_wk': nrm((HQ, HQ)), 'self_bk': jnp.zeros((HQ,), jnp.float32),
            'self_wv': nrm((HQ, HQ)), 'self_bv': jnp.zeros((HQ,), jnp.float32),
            'self_wo': nrm((HQ, HQ)), 'self_bo': jnp.zeros((HQ,), jnp.float32),
            'self_ln_g': jnp.ones((HQ,), jnp.float32), 'self_ln_b': jnp.zeros((HQ,), jnp.float32),
            'cross_wq': nrm((HQ, HQ)), 'cross_bq': jnp.zeros((HQ,), jnp.float32),
            'cross_wk': nrm((F, HQ)),  'cross_bk': jnp.zeros((HQ,), jnp.float32),
            'cross_wv': nrm((F, HQ)),  'cross_bv': jnp.zeros((HQ,), jnp.float32),
            'cross_wo': nrm((HQ, HQ)), 'cross_bo': jnp.zeros((HQ,), jnp.float32),
            'cross_ln_g': jnp.ones((HQ,), jnp.float32), 'cross_ln_b': jnp.zeros((HQ,), jnp.float32),
        })
    p['qformer_layers'] = qlayers

    olayers = []
    for _ in range(cfg['n_opt_layers']):
        olayers.append({
            'wq': nrm((D, D)), 'bq': jnp.zeros((D,), jnp.float32),
            'wk': nrm((D, D)), 'bk': jnp.zeros((D,), jnp.float32),
            'wv': nrm((D, D)), 'bv': jnp.zeros((D,), jnp.float32),
            'wo': nrm((D, D)), 'bo': jnp.zeros((D,), jnp.float32),
            'ln1_g': jnp.ones((D,), jnp.float32), 'ln1_b': jnp.zeros((D,), jnp.float32),
            'fc1_w': nrm((D, FF)), 'fc1_b': jnp.zeros((FF,), jnp.float32),
            'fc2_w': nrm((FF, D)), 'fc2_b': jnp.zeros((D,), jnp.float32),
            'ln2_g': jnp.ones((D,), jnp.float32), 'ln2_b': jnp.zeros((D,), jnp.float32),
        })
    p['opt_layers'] = olayers
    return p


def prepare_params(p):
    """One-time parameter prep: fuse QKV weights, cast matmul weights / tied LM head to bf16
    (f32 accumulation stays in-kernel), keep LayerNorm params and embedding tables in f32."""
    bf = lambda a: a.astype(jnp.bfloat16)
    out = {
        'ln_vision_g': p['ln_vision_g'], 'ln_vision_b': p['ln_vision_b'],
        'frame_pos_emb': p['frame_pos_emb'],
        'query_tokens': p['query_tokens'],
        'qf_emb_ln_g': p['qf_emb_ln_g'], 'qf_emb_ln_b': p['qf_emb_ln_b'],
        'opt_proj_w': bf(p['opt_proj_w']), 'opt_proj_b': p['opt_proj_b'],
        'opt_embed_tokens': p['opt_embed_tokens'],
        'opt_lm_head_bf16': bf(p['opt_embed_tokens']),
        'opt_embed_pos': p['opt_embed_pos'],
        'opt_final_ln_g': p['opt_final_ln_g'], 'opt_final_ln_b': p['opt_final_ln_b'],
    }
    qls = []
    for lp in p['qformer_layers']:
        qls.append({
            'self_wqkv': bf(jnp.concatenate([lp['self_wq'], lp['self_wk'], lp['self_wv']], axis=1)),
            'self_bqkv': jnp.concatenate([lp['self_bq'], lp['self_bk'], lp['self_bv']]),
            'self_wo': bf(lp['self_wo']), 'self_bo': lp['self_bo'],
            'self_ln_g': lp['self_ln_g'], 'self_ln_b': lp['self_ln_b'],
            'cross_wq': bf(lp['cross_wq']), 'cross_bq': lp['cross_bq'],
            'cross_wkv': bf(jnp.concatenate([lp['cross_wk'], lp['cross_wv']], axis=1)),
            'cross_bkv': jnp.concatenate([lp['cross_bk'], lp['cross_bv']]),
            'cross_wo': bf(lp['cross_wo']), 'cross_bo': lp['cross_bo'],
            'cross_ln_g': lp['cross_ln_g'], 'cross_ln_b': lp['cross_ln_b'],
        })
    out['qformer_layers'] = qls
    ols = []
    for lp in p['opt_layers']:
        ols.append({
            'wqkv': bf(jnp.concatenate([lp['wq'], lp['wk'], lp['wv']], axis=1)),
            'bqkv': jnp.concatenate([lp['bq'], lp['bk'], lp['bv']]),
            'wo': bf(lp['wo']), 'bo': lp['bo'],
            'ln1_g': lp['ln1_g'], 'ln1_b': lp['ln1_b'],
            'fc1_w': bf(lp['fc1_w']), 'fc1_b': lp['fc1_b'],
            'fc2_w': bf(lp['fc2_w']), 'fc2_b': lp['fc2_b'],
            'ln2_g': lp['ln2_g'], 'ln2_b': lp['ln2_b'],
        })
    out['opt_layers'] = ols
    return out


# ----------------------------- main -----------------------------

if __name__ == "__main__":
    # Small synthetic configuration (real module: num_features=1024, 32 query tokens, 6 Q-Former
    # layers, OPT checkpoint).  Scaled down, structure preserved.
    cfg = dict(B=2, T=2, N=4, F=32,              # video features: (B, T, N_patches, F)
               NQ=8, HQ=32, QH=4, n_q_layers=2,  # Q-Former: query tokens / hidden / heads / layers
               D=32, OH=4, FF=64, V=64, S=8,     # OPT: hidden / heads / ffn / vocab / text seq
               n_opt_layers=2, max_frame_pos=16, max_pos=64)

    key = jax.random.PRNGKey(0)
    params = prepare_params(init_params(key, cfg))

    k1, k2 = jax.random.split(jax.random.PRNGKey(0), 2)
    vid_features = jax.random.normal(k1, (cfg['B'], cfg['T'], cfg['N'], cfg['F']), jnp.float32)
    input_ids = jax.random.randint(k2, (cfg['B'], cfg['S']), 0, cfg['V'], dtype=jnp.int32)
    attention_mask = jnp.ones((cfg['B'], cfg['S']), jnp.int32).at[1, -2:].set(0)
    labels = jnp.where(attention_mask == 1, input_ids, -100)

    # TODO(synk): tokenizer / generate_text (beam-search decoding) paths are host-side and not
    # expressed as Pallas kernels; only the training forward (loss) path is implemented.
    loss = forward(params, vid_features, input_ids, attention_mask, labels, cfg)
    loss = jax.block_until_ready(loss)
    assert loss.shape == () and jnp.isfinite(loss)
    print("KERNEL_OK")
</pallas_src>

<mosaic_0001>
module attributes {stable_mosaic.version = 11 : i64} {
  func.func @_layernorm_kernel(%arg0: i32, %arg1: memref<16x32xf32, #tpu.memory_space<vmem>>, %arg2: memref<1x32xf32, #tpu.memory_space<vmem>>, %arg3: memref<1x32xf32, #tpu.memory_space<vmem>>, %arg4: memref<16x32xf32, #tpu.memory_space<vmem>>) attributes {dimension_semantics = [#tpu.dimension_semantics<parallel>], iteration_bounds = array<i64: 1>, scalar_prefetch = 0 : i64, scratch_operands = 0 : i64, tpu.core_type = #tpu.core_type<tc>, window_params = [{transform_indices = @transform_0, window_bounds = array<i64: 16, 32>}, {pipeline_mode = #tpu.pipeline_mode<synchronous>, transform_indices = @transform_1, window_bounds = array<i64: 1, 32>}, {pipeline_mode = #tpu.pipeline_mode<synchronous>, transform_indices = @transform_2, window_bounds = array<i64: 1, 32>}, {transform_indices = @transform_3, window_bounds = array<i64: 16, 32>}]} {
    %c0 = arith.constant 0 : index
    %c0_0 = arith.constant 0 : index
    %0 = vector.load %arg1[%c0, %c0_0] : memref<16x32xf32, #tpu.memory_space<vmem>>, vector<16x32xf32>
    %cst = arith.constant dense<0.000000e+00> : vector<16xf32>
    %1 = vector.multi_reduction <add>, %0, %cst [1] : vector<16x32xf32> to vector<16xf32>
    %2 = vector.shape_cast %1 : vector<16xf32> to vector<16x1xf32>
    %cst_1 = arith.constant 3.200000e+01 : f32
    %3 = vector.broadcast %cst_1 : f32 to vector<16x1xf32>
    %4 = arith.divf %2, %3 : vector<16x1xf32>
    %5 = vector.broadcast %4 : vector<16x1xf32> to vector<16x32xf32>
    %6 = arith.subf %0, %5 : vector<16x32xf32>
    %7 = arith.mulf %6, %6 : vector<16x32xf32>
    %cst_2 = arith.constant dense<0.000000e+00> : vector<16xf32>
    %8 = vector.multi_reduction <add>, %7, %cst_2 [1] : vector<16x32xf32> to vector<16xf32>
    %9 = vector.shape_cast %8 : vector<16xf32> to vector<16x1xf32>
    %cst_3 = arith.constant 3.200000e+01 : f32
    %10 = vector.broadcast %cst_3 : f32 to vector<16x1xf32>
    %11 = arith.divf %9, %10 : vector<16x1xf32>
    %12 = vector.broadcast %4 : vector<16x1xf32> to vector<16x32xf32>
    %13 = arith.subf %0, %12 : vector<16x32xf32>
    %cst_4 = arith.constant 9.99999974E-6 : f32
    %14 = vector.broadcast %cst_4 : f32 to vector<16x1xf32>
    %15 = arith.addf %11, %14 : vector<16x1xf32>
    %16 = math.rsqrt %15 : vector<16x1xf32>
    %17 = vector.broadcast %16 : vector<16x1xf32> to vector<16x32xf32>
    %18 = arith.mulf %13, %17 : vector<16x32xf32>
    %c0_5 = arith.constant 0 : index
    %c0_6 = arith.constant 0 : index
    %19 = vector.load %arg2[%c0_5, %c0_6] : memref<1x32xf32, #tpu.memory_space<vmem>>, vector<1x32xf32>
    %20 = vector.broadcast %19 : vector<1x32xf32> to vector<16x32xf32>
    %21 = arith.mulf %18, %20 : vector<16x32xf32>
    %c0_7 = arith.constant 0 : index
    %c0_8 = arith.constant 0 : index
    %22 = vector.load %arg3[%c0_7, %c0_8] : memref<1x32xf32, #tpu.memory_space<vmem>>, vector<1x32xf32>
    %23 = vector.broadcast %22 : vector<1x32xf32> to vector<16x32xf32>
    %24 = arith.addf %21, %23 : vector<16x32xf32>
    %c0_9 = arith.constant 0 : index
    %c0_10 = arith.constant 0 : index
    %25 = vector.load %arg4[%c0_9, %c0_10] : memref<16x32xf32, #tpu.memory_space<vmem>>, vector<16x32xf32>
    tpu.vector_store %arg4[%c0_9, %c0_10], %24 {strides = array<i32>} : memref<16x32xf32, #tpu.memory_space<vmem>>, vector<16x32xf32>,
    return
  }
  func.func @transform_0(%arg0: i32) -> (i32, i32) {
    %c0_i32 = arith.constant 0 : i32
    %c0_i32_0 = arith.constant 0 : i32
    return %arg0, %c0_i32 : i32, i32
  }
  func.func @transform_1(%arg0: i32) -> (i32, i32) {
    %c0_i32 = arith.constant 0 : i32
    %c0_i32_0 = arith.constant 0 : i32
    %c0_i32_1 = arith.constant 0 : i32
    return %c0_i32, %c0_i32_0 : i32, i32
  }
  func.func @transform_2(%arg0: i32) -> (i32, i32) {
    %c0_i32 = arith.constant 0 : i32
    %c0_i32_0 = arith.constant 0 : i32
    %c0_i32_1 = arith.constant 0 : i32
    return %c0_i32, %c0_i32_0 : i32, i32
  }
  func.func @transform_3(%arg0: i32) -> (i32, i32) {
    %c0_i32 = arith.constant 0 : i32
    %c0_i32_0 = arith.constant 0 : i32
    return %arg0, %c0_i32 : i32, i32
  }
}

</mosaic_0001>

<bundles_post_ra>
// kernel: tpu_custom_call.1
= control target key start
LH: loop header
LB: loop body
LE: loop exit
PB: predicated region body
PF: predicated region fallthrough
CT: control target
= control target key end

     0   :  { %8 = vsyncpa [#allocation3], 0  ;;  %s220_s0 = inlined_call_operand.hbm [shape: f32[16,32], index: 0, kind: input, shape index: {}]   ;;  %s221_s1 = inlined_call_operand.vmem [shape: f32[1,32], index: 1, kind: input, shape index: {}]   ;;  %s222_s2 = inlined_call_operand.vmem [shape: f32[1,32], index: 2, kind: input, shape index: {}]   ;;  %s223_s3 = inlined_call_operand.hbm [shape: f32[16,32], index: 3, kind: output, shape index: {}]  }
   0x1   :  { %9 = vsyncpa [#allocation4], 0  ;;  %s154_s12 = smov [#allocation2]   ;;  %s106_s16 = scalar_lea.hbm %s220_s0, 256 }
   0x2   :  { %s15_s13 = sshll.u32 %s154_s12, 4  ;;  %p107_p0 = scmp.ne.s32.totalorder %s220_s0, %s106_s16  ;;  %s16_s13 = int_to_ptr.vmem [resolvable:$true] %s15_s13 }
   0x3   :  { %p110_p1 = scmp.lt.u32.totalorder %s106_s16, %s220_s0 }
   0x5   :  { %p112_p2 = pnand %p110_p1, %p107_p0 }
   0x7   :  { %115 = shalt.err (!%p112_p2)
}
   0x8   :  { %s116_s21 = scalar_lea.vmem %s16_s13, 256  ;;  %p121_p4 = scmp.lt.s32.totalorder %s16_s13, %s16_s13 }
   0x9   :  { %p117_p3 = scmp.ne.s32.totalorder %s16_s13, %s116_s21  ;;  %p122_p5 = scmp.lt.s32.totalorder %s116_s21, %s116_s21 }
   0xb   :  { %p123_p6 = por %p122_p5, %p121_p4 }
   0xd   :  { %p124_p7 = pnand %p123_p6, %p117_p3 }
   0xf   :  { %127 = shalt.err (!%p124_p7)
}
  0x10   :  { %s155_s22 = smov 128   ;;  %s156_s23 = smov 8  }
  0x11   :  { %21 = dma.hbm_to_vmem [thread:$0]  %s220_s0, 256, %s16_s13, [#allocation3], %s155_s22, %s155_s22, %s156_s23  }
  0x12   :  { %150 = dma.done.wait [#allocation3], 256  }
  0x13   :  { %151 = vsyncadd [#allocation3], 4294967040  ;;  %vm31_vm0 = vcmask 261120   ;;  %v29_v0 = vld [vmem:[#allocation2] sm:$0xff]  ;;  %v30_v1 = vld [vmem:[#allocation2 + $0x8] sm:$0xff]  ;;  %s157_s29 = smov [#allocation5]  }
  0x14   :  { %v32_v2 = vsel %vm31_vm0, %v29_v0, 0.0  ;;  %v35_v3 = vsel %vm31_vm0, %v30_v1, 0.0  ;;  %v96_v21 = vld [vmem:[%s221_s1] ss:$0 sm:$0xff]  ;;  %s84_s30 = sshll.u32 %s157_s29, 4  ;;  %s85_s30 = int_to_ptr.vmem [resolvable:$true] %s84_s30 }
  0x15   :  { %33 = vadd.xlane.f32.xlu0 %v32_v2  ;;  %v97_v23 = vld [vmem:[%s222_s2] ss:$0 sm:$0xff]  ;;  %s128_s4 = scalar_lea.vmem %s85_s30, 256  ;;  %p133_p9 = scmp.lt.s32.totalorder %s85_s30, %s85_s30 }
  0x16   :  { %p129_p8 = scmp.ne.s32.totalorder %s85_s30, %s128_s4  ;;  %p134_p10 = scmp.lt.s32.totalorder %s128_s4, %s128_s4 }
  0x18   :  { %p135_p11 = por %p134_p10, %p133_p9 }
  0x19   :  { %36 = vadd.xlane.f32.xlu0 %v35_v3 }
  0x1a   :  { %p136_p12 = pnand %p135_p11, %p129_p8 }
  0xa2   :  { %v34_v4 = vpop.xlane.xlu0 %33 }
  0xa3   :  { %v39_v5 = vmul.f32 0.03125, %v34_v4 }
  0xa5   :  { %v41_v6 = vsub.f32 %v29_v0, %v39_v5 }
  0xa6   :  { %v37_v7 = vpop.xlane.xlu0 %36 }
  0xa7   :  { %v40_v8 = vmul.f32 0.03125, %v37_v7  ;;  %v43_v9 = vmul.f32 %v41_v6, %v41_v6 }
  0xa9   :  { %v42_v10 = vsub.f32 %v30_v1, %v40_v8  ;;  %v45_v11 = vsel %vm31_vm0, %v43_v9, 0.0 }
  0xaa   :  { %46 = vadd.xlane.f32.xlu1 %v45_v11 }
  0xab   :  { %v44_v12 = vmul.f32 %v42_v10, %v42_v10 }
  0xad   :  { %v48_v13 = vsel %vm31_vm0, %v44_v12, 0.0 }
  0xae   :  { %49 = vadd.xlane.f32.xlu1 %v48_v13 }
 0x137   :  { %v47_v14 = vpop.xlane.xlu1 %46 }
 0x138   :  { %v51_v15 = vmul.f32 0.03125, %v47_v14 }
 0x13a   :  { %v53_v16 = vadd.f32 1e-05, %v51_v15 }
 0x13b   :  { %v50_v17 = vpop.xlane.xlu1 %49 }
 0x13c   :  { %102 = vrsqrt.f32 %v53_v16  ;;  %v52_v18 = vmul.f32 0.03125, %v50_v17 }
 0x13e   :  { %v54_v19 = vadd.f32 1e-05, %v52_v18 }
 0x140   :  { %104 = vrsqrt.f32 %v54_v19 }
 0x146   :  { %v103_v20 = vpop.eup %102 }
 0x147   :  { %v57_v22 = vmul.f32 %v103_v20, %v41_v6 }
 0x149   :  { %v66_v24 = vmul.f32 %v96_v21, %v57_v22 }
 0x14a   :  { %v105_v25 = vpop.eup %104 }
 0x14b   :  { %v58_v26 = vmul.f32 %v105_v25, %v42_v10  ;;  %v75_v27 = vadd.f32 %v97_v23, %v66_v24 }
 0x14d   :  { %v67_v28 = vmul.f32 %v96_v21, %v58_v26  ;;  %77 = vst.msk [vmem:[#allocation5] sm:$0xff] %vm31_vm0, %v75_v27 }
 0x14f   :  { %v76_v29 = vadd.f32 %v97_v23, %v67_v28 }
 0x151   :  { %78 = vst.msk [vmem:[#allocation5 + $0x8] sm:$0xff] %vm31_vm0, %v76_v29 }
 0x152   :  { %139 = shalt.err (!%p136_p12)
}
 0x153   :  { %s140_s5 = scalar_lea.hbm %s223_s3, 256 }
 0x154   :  { %p141_p13 = scmp.ne.s32.totalorder %s223_s3, %s140_s5  ;;  %p144_p0 = scmp.lt.u32.totalorder %s140_s5, %s223_s3 }
 0x156   :  { %p146_p1 = pnand %p144_p0, %p141_p13 }
 0x158   :  { %149 = shalt.err (!%p146_p1)
}
 0x159   :  { %90 = dma.vmem_to_hbm [thread:$0]  %s85_s30, 256, %s223_s3, [#allocation4], %s155_s22, %s155_s22, %s156_s23  }
 0x15a   :  { %152 = dma.done.wait [#allocation4], 256  }
 0x15b   :  { %153 = vsyncadd [#allocation4], 4294967040 }
 0x15c   :  { %94 = vsyncpa [#allocation3], 1 }
 0x15d   :  { %95 = vsyncpa [#allocation4], 1 }

</bundles_post_ra>
